<compile_context>
chip_gen: v6e
topology: v6e:2x2x1
jax: 0.10.0
libtpu: 0.0.40
codegen_flags: <defaults>
</compile_context>

<pallas_src>
import functools

import jax
import jax.numpy as jnp
import numpy as np
from jax.experimental import pallas as pl
from jax.experimental.pallas import tpu as pltpu


# ----------------------------- kernels ------------------------------------------


def _reinforce_first_kernel(r_ref, lp_ref, part_ref, new_b_ref):
    """First EMA call: baseline == 0, so advantage = reward and new baseline = reward."""
    r = r_ref[...].astype(jnp.float32)
    lp = lp_ref[...].astype(jnp.float32)
    # per-row partial of sum(log_prob * advantage); sign / 1/N applied in the wrapper.
    part_ref[...] = jnp.sum(lp * r, axis=-1, keepdims=True)
    new_b_ref[...] = r


def _reinforce_ema_kernel(r_ref, lp_ref, b_ref, part_ref, new_b_ref, *, decay):
    """Steady-state call: advantage = r - baseline; baseline <- a*r + (1-a)*baseline."""
    r = r_ref[...].astype(jnp.float32)
    lp = lp_ref[...].astype(jnp.float32)
    b = b_ref[...]
    adv = r - b
    part_ref[...] = jnp.sum(lp * adv, axis=-1, keepdims=True)
    # literal PyTorch ExpoMovingAverage update.
    new_b_ref[...] = jnp.float32(decay) * r + jnp.float32(1.0 - decay) * b


# --------------------------- layout / config helpers -----------------------------


@functools.lru_cache(maxsize=1)
def _hardware_config():
    """(target block bytes per array, vmem_limit_bytes) chosen per TPU generation."""
    vmem_cap = None
    try:
        info = pltpu.get_tpu_info()
        for name in ("vmem_capacity_bytes", "vmem_size_bytes", "vmem_bytes"):
            v = getattr(info, name, None)
            if isinstance(v, int) and v > 0:
                vmem_cap = v
                break
    except Exception:
        vmem_cap = None
    if vmem_cap is None:
        vmem_cap = 64 * 1024 * 1024  # conservative (v7x-sized) default
    if vmem_cap >= 100 * 1024 * 1024:
        # v5e / v6e class: 128 MiB physical VMEM -> bigger tiles, higher limit.
        return 4 * 1024 * 1024, 64 * 1024 * 1024
    # v7x class: 64 MiB physical VMEM -> keep residency modest.
    return 2 * 1024 * 1024, 40 * 1024 * 1024


def _plan(B, T, target_block_bytes):
    """Pick a lane-dense 2-D layout and tile size.

    Returns (flat, W, rows_pad, tb, grid_n):
      flat     : whether the arrays must be flattened + zero-padded to (rows_pad, W)
      W        : last dim of the kernel layout (multiple of 128)
      rows_pad : padded row count (== grid_n * tb)
      tb       : rows per tile (multiple of 8)
      grid_n   : number of grid steps
    """
    if T % 128 == 0 and B % 8 == 0:
        # Fast path: tile (B, T) in place (no relayout traffic).
        W, rows = T, B
        max_rows = max(8, (target_block_bytes // (4 * W)) // 8 * 8)
        tb, r, cap = 8, 8, min(rows, max_rows)
        while r <= cap:               # largest multiple-of-8 divisor of B within budget
            if rows % r == 0:
                tb = r
            r += 8
        return False, W, rows, tb, rows // tb

    # Slow path: flatten to a lane-dense (rows_pad, W) layout with zero padding.
    N = B * T
    W = 512 if N >= 8 * 512 else 128
    rows = -(-N // W)
    rows8 = ((rows + 7) // 8) * 8
    max_rows = max(8, (target_block_bytes // (4 * W)) // 8 * 8)
    tb = min(max_rows, rows8)
    grid_n = -(-rows // tb)
    rows_pad = grid_n * tb
    return True, W, rows_pad, tb, grid_n


def _to_layout(x, flat, W, rows_pad):
    if not flat:
        return x
    xf = x.reshape(-1)
    pad = rows_pad * W - xf.shape[0]
    if pad:
        xf = jnp.pad(xf, (0, pad))      # zero pad => padded elements contribute 0 loss
    return xf.reshape(rows_pad, W)


def _from_layout(y2d, flat, shape):
    if not flat:
        return y2d
    n = int(np.prod(shape))
    return y2d.reshape(-1)[:n].reshape(shape)


# ------------------------------ jitted impls -------------------------------------


@functools.partial(jax.jit, static_argnames=("target_block_bytes", "vmem_limit_bytes"))
def _reinforce_first_impl(reward, log_prob, *, target_block_bytes, vmem_limit_bytes):
    B, T = reward.shape
    flat, W, rows_pad, tb, grid_n = _plan(B, T, target_block_bytes)
    r2d = _to_layout(reward, flat, W, rows_pad)
    lp2d = _to_layout(log_prob, flat, W, rows_pad)

    tile_spec = pl.BlockSpec((tb, W), lambda i: (i, 0))
    part_spec = pl.BlockSpec((tb, 1), lambda i: (i, 0))

    partials, new_b2d = pl.pallas_call(
        _reinforce_first_kernel,
        out_shape=(jax.ShapeDtypeStruct((rows_pad, 1), jnp.float32),
                   jax.ShapeDtypeStruct((rows_pad, W), jnp.float32)),
        grid=(grid_n,),
        in_specs=[tile_spec, tile_spec],
        out_specs=(part_spec, tile_spec),
        compiler_params=pltpu.CompilerParams(
            dimension_semantics=("parallel",),      # no carried state -> shard across TCs
            vmem_limit_bytes=vmem_limit_bytes),
        cost_estimate=pl.CostEstimate(
            flops=2 * rows_pad * W, transcendentals=0,
            bytes_accessed=3 * rows_pad * W * 4),
    )(r2d, lp2d)

    inv_n = 1.0 / float(B * T)
    loss = jnp.sum(partials) * jnp.float32(-inv_n)   # sign folded into finalize
    return loss, _from_layout(new_b2d, flat, (B, T))


@functools.partial(jax.jit,
                   static_argnames=("decay", "target_block_bytes", "vmem_limit_bytes"),
                   donate_argnames=("baseline",))
def _reinforce_ema_impl(reward, log_prob, baseline, *, decay, target_block_bytes,
                        vmem_limit_bytes):
    B, T = reward.shape
    flat, W, rows_pad, tb, grid_n = _plan(B, T, target_block_bytes)
    r2d = _to_layout(reward, flat, W, rows_pad)
    lp2d = _to_layout(log_prob, flat, W, rows_pad)
    b2d = _to_layout(baseline.astype(jnp.float32), flat, W, rows_pad)

    tile_spec = pl.BlockSpec((tb, W), lambda i: (i, 0))
    part_spec = pl.BlockSpec((tb, 1), lambda i: (i, 0))
    kernel = functools.partial(_reinforce_ema_kernel, decay=float(decay))

    partials, new_b2d = pl.pallas_call(
        kernel,
        out_shape=(jax.ShapeDtypeStruct((rows_pad, 1), jnp.float32),
                   jax.ShapeDtypeStruct((rows_pad, W), jnp.float32)),
        grid=(grid_n,),
        in_specs=[tile_spec, tile_spec, tile_spec],
        out_specs=(part_spec, tile_spec),
        input_output_aliases={2: 1},                 # baseline -> new_baseline (in place)
        compiler_params=pltpu.CompilerParams(
            dimension_semantics=("parallel",),
            vmem_limit_bytes=vmem_limit_bytes),
        cost_estimate=pl.CostEstimate(
            flops=6 * rows_pad * W, transcendentals=0,
            bytes_accessed=4 * rows_pad * W * 4),
    )(r2d, lp2d, b2d)

    inv_n = 1.0 / float(B * T)
    loss = jnp.sum(partials) * jnp.float32(-inv_n)
    return loss, _from_layout(new_b2d, flat, (B, T))


# ------------------------------ public wrapper ------------------------------------


def reinforce_loss_with_ema_step(reward, log_prob, baseline, t, decay_factor=0.9999,
                                 target_block_bytes=None):
    """One forward pass of REINFORCELossWithEMA. Returns (loss, new_baseline, new_t).

    `baseline` is ignored on the first call (t == 0), matching the PyTorch module
    where the baseline is 0 before the first EMA update.
    """
    if not (0.0 < decay_factor < 1.0):
        raise ValueError("decay_factor must be in (0, 1)")
    hw_block, vmem_limit = _hardware_config()
    if target_block_bytes is None:
        target_block_bytes = hw_block
    t_new = t + 1  # ExpoMovingAverage increments before branching
    if t_new == 1:
        loss, new_base = _reinforce_first_impl(
            reward, log_prob,
            target_block_bytes=int(target_block_bytes),
            vmem_limit_bytes=int(vmem_limit))
    else:
        loss, new_base = _reinforce_ema_impl(
            reward, log_prob, baseline,
            decay=float(decay_factor),
            target_block_bytes=int(target_block_bytes),
            vmem_limit_bytes=int(vmem_limit))
    return loss, new_base, t_new


def _reference_step(reward, log_prob, baseline, t, decay=0.9999):
    """Pure-JAX reference of the literal PyTorch semantics."""
    adv = reward - baseline
    loss = jnp.mean(-log_prob * adv)
    t_new = t + 1
    if t_new == 1:
        new_base = reward
    else:
        new_base = decay * reward + (1.0 - decay) * baseline
    return loss, new_base, t_new


# --------------------------------- demo / test -------------------------------------


if __name__ == "__main__":
    key = jax.random.PRNGKey(0)
    k1, k2, k3, k4, k5, k6, k7 = jax.random.split(key, 7)

    # ---- run A: aligned shape, forced-small tiles -> 4-step parallel grid ----
    B, T = 32, 128
    reward1 = jax.random.normal(k1, (B, T), dtype=jnp.float32)
    log_prob1 = -jnp.abs(jax.random.normal(k2, (B, T), dtype=jnp.float32))
    reward2 = jax.random.normal(k3, (B, T), dtype=jnp.float32)
    log_prob2 = log_prob1 * 0.5

    t = 0
    loss1, baseline, t = reinforce_loss_with_ema_step(
        reward1, log_prob1, None, t, target_block_bytes=4096)          # t==1 branch
    loss2, baseline, t = reinforce_loss_with_ema_step(
        reward2, log_prob2, baseline, t, target_block_bytes=4096)      # EMA branch
    loss1 = jax.block_until_ready(loss1)
    loss2 = jax.block_until_ready(loss2)
    baseline = jax.block_until_ready(baseline)

    rbase = jnp.zeros((B, T), dtype=jnp.float32)
    rl1, rbase, rt = _reference_step(reward1, log_prob1, rbase, 0)
    rl2, rbase, rt = _reference_step(reward2, log_prob2, rbase, rt)
    np.testing.assert_allclose(np.asarray(loss1), np.asarray(rl1), rtol=1e-5, atol=1e-5)
    np.testing.assert_allclose(np.asarray(loss2), np.asarray(rl2), rtol=1e-5, atol=1e-5)
    np.testing.assert_allclose(np.asarray(baseline), np.asarray(rbase), rtol=1e-5, atol=1e-5)

    # ---- run B: aligned shape, default (chip-aware) tile -> single block ----
    B2, T2 = 16, 256
    rb1 = jax.random.normal(k4, (B2, T2), dtype=jnp.float32)
    lpb1 = -jnp.abs(jax.random.normal(k5, (B2, T2), dtype=jnp.float32))
    lb1, base_b, _ = reinforce_loss_with_ema_step(rb1, lpb1, None, 0)
    lb1 = jax.block_until_ready(lb1)
    base_b = jax.block_until_ready(base_b)
    rl_b1, rbase_b, _ = _reference_step(rb1, lpb1, jnp.zeros((B2, T2), jnp.float32), 0)
    np.testing.assert_allclose(np.asarray(lb1), np.asarray(rl_b1), rtol=1e-5, atol=1e-5)
    np.testing.assert_allclose(np.asarray(base_b), np.asarray(rbase_b), rtol=1e-5, atol=1e-5)

    # ---- run C: unaligned (B, T) -> flattened + zero-padded lane-dense layout ----
    B3, T3 = 5, 37
    rc1 = jax.random.normal(k6, (B3, T3), dtype=jnp.float32)
    lpc1 = -jnp.abs(jax.random.normal(k7, (B3, T3), dtype=jnp.float32))
    rc2 = rc1 * 0.3 + 0.1
    lpc2 = lpc1 * 0.7

    tc = 0
    lc1, base_c, tc = reinforce_loss_with_ema_step(rc1, lpc1, None, tc)
    lc2, base_c, tc = reinforce_loss_with_ema_step(rc2, lpc2, base_c, tc)
    lc1 = jax.block_until_ready(lc1)
    lc2 = jax.block_until_ready(lc2)
    base_c = jax.block_until_ready(base_c)

    rbc = jnp.zeros((B3, T3), dtype=jnp.float32)
    rlc1, rbc, rtc = _reference_step(rc1, lpc1, rbc, 0)
    rlc2, rbc, rtc = _reference_step(rc2, lpc2, rbc, rtc)
    np.testing.assert_allclose(np.asarray(lc1), np.asarray(rlc1), rtol=1e-5, atol=1e-5)
    np.testing.assert_allclose(np.asarray(lc2), np.asarray(rlc2), rtol=1e-5, atol=1e-5)
    np.testing.assert_allclose(np.asarray(base_c), np.asarray(rbc), rtol=1e-5, atol=1e-5)

    print("KERNEL_OK")
</pallas_src>

<mosaic_0001>
module attributes {stable_mosaic.version = 11 : i64} {
  func.func @_reinforce_first_kernel(%arg0: i32, %arg1: memref<8x128xf32, #tpu.memory_space<vmem>>, %arg2: memref<8x128xf32, #tpu.memory_space<vmem>>, %arg3: memref<8x1xf32, #tpu.memory_space<vmem>>, %arg4: memref<8x128xf32, #tpu.memory_space<vmem>>) attributes {dimension_semantics = [#tpu.dimension_semantics<parallel>], iteration_bounds = array<i64: 4>, scalar_prefetch = 0 : i64, scratch_operands = 0 : i64, tpu.core_type = #tpu.core_type<tc>, window_params = [{transform_indices = @transform_0, window_bounds = array<i64: 8, 128>}, {transform_indices = @transform_1, window_bounds = array<i64: 8, 128>}, {transform_indices = @transform_2, window_bounds = array<i64: 8, 1>}, {transform_indices = @transform_3, window_bounds = array<i64: 8, 128>}]} {
    %c0 = arith.constant 0 : index
    %c0_0 = arith.constant 0 : index
    %0 = vector.load %arg1[%c0, %c0_0] : memref<8x128xf32, #tpu.memory_space<vmem>>, vector<8x128xf32>
    %c0_1 = arith.constant 0 : index
    %c0_2 = arith.constant 0 : index
    %1 = vector.load %arg2[%c0_1, %c0_2] : memref<8x128xf32, #tpu.memory_space<vmem>>, vector<8x128xf32>
    %2 = arith.mulf %1, %0 : vector<8x128xf32>
    %cst = arith.constant dense<0.000000e+00> : vector<8xf32>
    %3 = vector.multi_reduction <add>, %2, %cst [1] : vector<8x128xf32> to vector<8xf32>
    %4 = vector.shape_cast %3 : vector<8xf32> to vector<8x1xf32>
    %c0_3 = arith.constant 0 : index
    %c0_4 = arith.constant 0 : index
    %5 = vector.load %arg3[%c0_3, %c0_4] : memref<8x1xf32, #tpu.memory_space<vmem>>, vector<8x1xf32>
    tpu.vector_store %arg3[%c0_3, %c0_4], %4 {strides = array<i32>} : memref<8x1xf32, #tpu.memory_space<vmem>>, vector<8x1xf32>,
    %c0_5 = arith.constant 0 : index
    %c0_6 = arith.constant 0 : index
    %6 = vector.load %arg4[%c0_5, %c0_6] : memref<8x128xf32, #tpu.memory_space<vmem>>, vector<8x128xf32>
    tpu.vector_store %arg4[%c0_5, %c0_6], %0 {strides = array<i32>} : memref<8x128xf32, #tpu.memory_space<vmem>>, vector<8x128xf32>,
    return
  }
  func.func @transform_0(%arg0: i32) -> (i32, i32) {
    %c0_i32 = arith.constant 0 : i32
    %c0_i32_0 = arith.constant 0 : i32
    return %arg0, %c0_i32 : i32, i32
  }
  func.func @transform_1(%arg0: i32) -> (i32, i32) {
    %c0_i32 = arith.constant 0 : i32
    %c0_i32_0 = arith.constant 0 : i32
    return %arg0, %c0_i32 : i32, i32
  }
  func.func @transform_2(%arg0: i32) -> (i32, i32) {
    %c0_i32 = arith.constant 0 : i32
    %c0_i32_0 = arith.constant 0 : i32
    return %arg0, %c0_i32 : i32, i32
  }
  func.func @transform_3(%arg0: i32) -> (i32, i32) {
    %c0_i32 = arith.constant 0 : i32
    %c0_i32_0 = arith.constant 0 : i32
    return %arg0, %c0_i32 : i32, i32
  }
}

</mosaic_0001>

<bundles_post_ra>
// kernel: _reinforce_first_impl.1
= control target key start
LH: loop header
LB: loop body
LE: loop exit
PB: predicated region body
PF: predicated region fallthrough
CT: control target
= control target key end

     0   :  { %9 = vsyncpa [#allocation3], 0  ;;  %s793_s0 = inlined_call_operand.hbm [shape: f32[32,128], index: 0, kind: input, shape index: {}]   ;;  %s794_s1 = inlined_call_operand.hbm [shape: f32[32,128], index: 1, kind: input, shape index: {}]   ;;  %s795_s2 = inlined_call_operand.vmem [shape: f32[32,1], index: 2, kind: output, shape index: {0}]   ;;  %s796_s3 = inlined_call_operand.hbm [shape: f32[32,128], index: 3, kind: output, shape index: {1}]  }
   0x1   :  { %11 = vsyncpa [#allocation3 + $0x1], 0 }
   0x2   :  { %12 = vsyncpa [#allocation6], 0 }
   0x3   :  { %14 = vsyncpa [#allocation6 + $0x1], 0 }
   0x4   :  { %15 = vsyncpa [#allocation4], 0 }
   0x5   :  { %17 = vsyncpa [#allocation4 + $0x1], 0  ;;  %s596_s12 = smov 0   ;;  %s598_s13 = smov 0  }
   0x6   :  { %s600_s14 = smov 0   ;;  %s602_s15 = smov 0  }
   0x7 LB: > { %s617_s16 = sadd.s32 4294967295, %s571_s15   ;;  %s380_s17 = sadd.s32 4294967294, %s571_s15   ;;  %s571_s15 = sphi %s602_s15, %s814_s15   ;;  %s567_s14 = sphi %s600_s14, %s813_s14   ;;  %s563_s13 = sphi %s598_s13, %s812_s13   ;;  %s559_s12 = sphi %s596_s12, %s811_s12  }
   0x8   : > { %s621_s18 = sadd.s32 1, %s571_s15   ;;  %s30_s19 = sadd.s32 1, %s567_s14 }
   0x9   : > { %s27_s20 = ssub.s32 %s571_s15, %s621_s18  ;;  %p37_p0 = scmp.ne.s32.totalorder %s567_s14, %s563_s13 }
   0xa   : > { %p28_p1 = scmp.eq.s32.totalorder %s27_s20, 0  ;;  %p38_p2 = scmp.eq.s32.totalorder %s571_s15, 0 }
   0xb   : > { %p43_p3 = scmp.ne.s32.totalorder %s563_s13, %s559_s12  ;;  %p44_p4 = scmp.eq.s32.totalorder %s617_s16, 0 }
   0xc   : > { %s633_s21 = scalar_select %p28_p1, %s567_s14, %s30_s19  }
   0xd   : > { %p635_p5 = por %p38_p2, %p37_p0  ;;  %p639_p6 = por %p44_p4, %p43_p3 }
   0xe   : > { %p119_p7 = scmp.eq.s32.totalorder %s617_s16, 3  ;;  %p125_p8 = scmp.eq.s32.totalorder %s380_s17, 3 }
   0xf   : > { %s800_s23 = scalar_select %p639_p6, 1, 0 }
  0x10   : > { %p413_p9 = scmp.lt.s32.totalorder %s571_s15, 4  ;;  %p645_p10 = por %p119_p7, %p37_p0 }
  0x11   : > { %p649_p11 = por %p125_p8, %p43_p3  ;;  %s654_s26 = sand.u32 1, %s567_s14  }
  0x12   : > { %s801_s24 = scalar_select %p645_p10, 1, 0 }
  0x13   : > { %s802_s25 = scalar_select %p649_p11, 1, 0 }
  0x14   : > { %s384_s27 = sshll.u32 %s571_s15, 7  ;;  %s383_s28 = sshll.u32 %s654_s26, 3 }
  0x15   : > { %s663_s4 = scalar_lea.hbm %s793_s0, %s384_s27  ;;  %s149_s5 = scalar_lea.vmem [#allocation2], %s383_s28 }
  0x16   : > { %s156_s6 = sshll.u32 %s149_s5, 4  ;;  %p669_p12 = pnand %p413_p9, %p635_p5  ;;  %s673_s6 = int_to_ptr.vmem [resolvable:$true] %s156_s6 }
  0x17   : > { %s146_s8 = scalar_lea.sflag [#allocation3], %s654_s26  ;;  %s447_s9 = scalar_lea.hbm %s663_s4, 128 }
  0x18   : > { %p448_p1 = scmp.ne.s32.totalorder %s663_s4, %s447_s9  ;;  %p449_p2 = pneg %p669_p12 }
  0x19   : > { %s452_s17 = scalar_lea.hbm %s793_s0, 512  ;;  %p453_p5 = scmp.lt.s32.totalorder %s663_s4, %s793_s0 }
  0x1a   : > { %p450_p3 = pnand %p449_p2, %p448_p1  ;;  %p454_p7 = scmp.lt.s32.totalorder %s452_s17, %s447_s9 }
  0x1c   : > { %p451_p4 = pneg %p450_p3  ;;  %p455_p8 = por %p454_p7, %p453_p5 }
  0x1e   : > { %p456_p9 = pnand %p455_p8, %p451_p4 }
  0x20   : > { %459 = shalt.err (!%p456_p9)
}
  0x21   : > { %s460_s22 = scalar_lea.vmem %s673_s6, 128  ;;  %s573_s29 = smov [#allocation2]  }
  0x22   : > { %p461_p13 = scmp.ne.s32.totalorder %s673_s6, %s460_s22  ;;  %s465_s30 = sshll.u32 %s573_s29, 4  ;;  %s466_s30 = int_to_ptr.vmem [resolvable:$false] %s465_s30 }
  0x23   : > { %s467_s5 = scalar_lea.vmem %s466_s30, 256  ;;  %p468_p0 = scmp.lt.s32.totalorder %s673_s6, %s466_s30 }
  0x24   : > { %p463_p1 = pnand %p461_p13, %p449_p2  ;;  %p469_p11 = scmp.lt.s32.totalorder %s467_s5, %s460_s22 }
  0x26   : > { %p464_p3 = pneg %p463_p1  ;;  %p470_p10 = por %p469_p11, %p468_p0 }
  0x28   : > { %p471_p5 = pnand %p470_p10, %p464_p3 }
  0x2a   : > { %474 = shalt.err (!%p471_p5)
}
  0x2b   : > { %405 = dma.hbm_to_vmem [thread:$0]  (!%p669_p12), %s663_s4, 128, %s673_s6, %s146_s8  }
  0x2c   : > { %p804_p13 = scmp.lt.s32.totalorder %s571_s15, 5  ;;  %p805_p4 = scmp.ge.s32.totalorder %s571_s15, 1 }
  0x2d   : > { %s715_s17 = scalar_lea.hbm %s794_s1, %s384_s27  ;;  %s167_s19 = scalar_lea.vmem [#allocation5], %s383_s28 }
  0x2e   : > { %p706_p7 = pnand %p805_p4, %p804_p13  ;;  %s174_s20 = sshll.u32 %s167_s19, 4  ;;  %s175_s20 = int_to_ptr.vmem [resolvable:$true] %s174_s20 }
  0x2f   : > { %s164_s4 = scalar_lea.sflag [#allocation6], %s654_s26  ;;  %s475_s6 = scalar_lea.hbm %s715_s17, 128 }
  0x30   : > { %s806_s9 = scalar_select %p706_p7, 1, 0 }
  0x31   : > { %p476_p10 = scmp.ne.s32.totalorder %s715_s17, %s475_s6  ;;  %s480_s29 = scalar_lea.hbm %s794_s1, 512 }
  0x32   : > { %p481_p8 = scmp.lt.s32.totalorder %s715_s17, %s794_s1  ;;  %p482_p9 = scmp.lt.s32.totalorder %s480_s29, %s475_s6 }
  0x33   : > { %p478_p11 = pnand %p476_p10, %p449_p2 }
  0x34   : > { %p483_p1 = por %p482_p9, %p481_p8 }
  0x35   : > { %p479_p0 = pneg %p478_p11 }
  0x37   : > { %p484_p3 = pnand %p483_p1, %p479_p0 }
  0x39   : > { %487 = shalt.err (!%p484_p3)
}
  0x3a   : > { %s488_s28 = scalar_lea.vmem %s175_s20, 128  ;;  %s574_s26 = smov [#allocation5]  }
  0x3b   : > { %p489_p5 = scmp.ne.s32.totalorder %s175_s20, %s488_s28  ;;  %s493_s5 = sshll.u32 %s574_s26, 4  ;;  %s494_s5 = int_to_ptr.vmem [resolvable:$false] %s493_s5 }
  0x3c   : > { %s495_s10 = scalar_lea.vmem %s494_s5, 256  ;;  %p496_p10 = scmp.lt.s32.totalorder %s175_s20, %s494_s5 }
  0x3d   : > { %p491_p13 = pnand %p489_p5, %p449_p2  ;;  %p497_p11 = scmp.lt.s32.totalorder %s495_s10, %s488_s28 }
  0x3f   : > { %p492_p4 = pneg %p491_p13  ;;  %p498_p6 = por %p497_p11, %p496_p10 }
  0x41   : > { %p499_p7 = pnand %p498_p6, %p492_p4 }
  0x43   : > { %502 = shalt.err (!%p499_p7)
}
  0x44   : > { %408 = dma.hbm_to_vmem [thread:$0]  (!%p669_p12), %s715_s17, 128, %s175_s20, %s164_s4  }
  0x45   : > { %p807_p0 = scmp.ne.s32.totalorder %s806_s9, 0 }
  0x46   : > { %s741_s11 = sand.u32 (!%p807_p0), 1, %s563_s13   ;;  %p808_p2 = scmp.ne.s32.totalorder (!%p807_p0), %s800_s23, 0 }
  0x47   : > { %183 = sbr.rel (%p807_p0) target bundleno = 221 (0xdd), region = 28  ;;  %s388_s19 = sshll.u32 (!%p807_p0), %s741_s11, 3 }
  0x48   : > { %s186_s6 = scalar_lea.sflag (!%p807_p0), [#allocation3], %s741_s11  ;;  %s189_s8 = scalar_lea.vmem (!%p807_p0), [#allocation2], %s388_s19 }
  0x4c   : > { %546 = dma.done.wait (%p808_p2), %s186_s6, 128  }
  0x4d   : > { %548 = vsyncadd (%p808_p2), %s186_s6, 4294967168  ;;  %s195_s7 = scalar_lea.sflag [#allocation6], %s741_s11  ;;  %s198_s17 = scalar_lea.vmem [#allocation5], %s388_s19 }
  0x4e   : > { %550 = dma.done.wait (%p808_p2), %s195_s7, 128  }
  0x4f   : > { %552 = vsyncadd (%p808_p2), %s195_s7, 4294967168  ;;  %v234_v0 = vld [vmem:[%s189_s8] sm:$0xff]  ;;  %v235_v1 = vld [vmem:[%s198_s17] sm:$0xff]  ;;  %s229_s9 = scalar_lea.vmem [#allocation7], %s388_s19  ;;  %s393_s20 = sshll.u32 %s617_s16, 7 }
  0x50   : > { %v236_v2 = vmul.f32 %v235_v1, %v234_v0  ;;  %241 = vst [vmem:[%s229_s9] sm:$0xff] %v234_v0  ;;  %s263_s4 = sshll.u32 %s229_s9, 4  ;;  %s261_s27 = scalar_lea.hbm %s796_s3, %s393_s20  ;;  %s264_s4 = int_to_ptr.vmem [resolvable:$true] %s263_s4 }
  0x51   : > { %s247_s30 = scalar_lea.sflag [#allocation4], %s741_s11  ;;  %s503_s28 = scalar_lea.vmem %s264_s4, 128 }
  0x52   : > { %237 = vadd.xlane.f32.xlu0 %v236_v2  ;;  %p504_p6 = scmp.ne.s32.totalorder %s264_s4, %s503_s28  ;;  %p809_p12 = scmp.ne.s32.totalorder %s801_s24, 0 }
  0x53   : > { %s575_s23 = smov [#allocation7]  }
  0x54   : > { %p505_p7 = pnand %p504_p6, %p809_p12  ;;  %s507_s26 = sshll.u32 %s575_s23, 4  ;;  %s508_s26 = int_to_ptr.vmem [resolvable:$false] %s507_s26 }
  0x55   : > { %s509_s5 = scalar_lea.vmem %s508_s26, 256  ;;  %p510_p9 = scmp.lt.s32.totalorder %s264_s4, %s508_s26 }
  0x56   : > { %p506_p8 = pneg %p505_p7  ;;  %p511_p1 = scmp.lt.s32.totalorder %s509_s5, %s503_s28 }
  0x58   : > { %p512_p3 = por %p511_p1, %p510_p9 }
  0x5a   : > { %p513_p5 = pnand %p512_p3, %p506_p8 }
  0x5c   : > { %516 = shalt.err (!%p513_p5)
}
  0x5d   : > { %s517_s10 = scalar_lea.hbm %s261_s27, 128  ;;  %s521_s6 = scalar_lea.hbm %s796_s3, 512 }
  0x5e   : > { %p518_p13 = scmp.ne.s32.totalorder %s261_s27, %s517_s10  ;;  %p522_p11 = scmp.lt.s32.totalorder %s261_s27, %s796_s3 }
  0x5f   : > { %p523_p0 = scmp.lt.s32.totalorder %s521_s6, %s517_s10 }
  0x60   : > { %p519_p4 = pnand %p518_p13, %p809_p12 }
  0x61   : > { %p524_p2 = por %p523_p0, %p522_p11 }
  0x62   : > { %p520_p10 = pneg %p519_p4 }
  0x64   : > { %p525_p6 = pnand %p524_p2, %p520_p10 }
  0x66   : > { %528 = shalt.err (!%p525_p6)
}
  0x67   : > { %400 = dma.vmem_to_hbm [thread:$0]  (%p809_p12), %s264_s4, 128, %s261_s27, %s247_s30   ;;  %vm239_vm0 = vcmask 7168  }
  0x68   : > { %p230_p7 = scmp.lt.s32.totalorder %s617_s16, 3 }
  0x6a   : > { %s816_s16 = smov (!%p230_p7, %s617_s16), 3 }
  0x6b   : > { %s391_s17 = sshll.u32 %s816_s16, 3 }
  0x6c   : > { %s233_s22 = scalar_lea.vmem %s795_s2, %s391_s17 }
  0xdb   : > { %v238_v3 = vpop.xlane.xlu0 %237 }
  0xdc   : > { %240 = vst.msk [vmem:[%s233_s22] sm:$0xff] %vm239_vm0, %v238_v3 }
  0xdd PF: > { %p414_p8 = scmp.ge.s32.totalorder %s571_s15, 2  ;;  %s282_s29 = sand.u32 1, %s559_s12  }
  0xde   : > { %p810_p9 = scmp.ne.s32.totalorder %s802_s25, 0  ;;  %s283_s24 = scalar_lea.sflag [#allocation4], %s282_s29 }
  0xe0   : > { %p410_p1 = pnand %p414_p8, %p810_p9 }
  0xe2   : > { %p411_p3 = pneg %p410_p1 }
  0xe4   : > { %554 = dma.done.wait (%p411_p3), %s283_s24, 128  }
  0xe5   : > { %556 = vsyncadd (%p411_p3), %s283_s24, 4294967168  ;;  %p20_p12 = scmp.ge.s32.totalorder %s621_s18, 6   ;;  %s811_s12 = smov %s563_s13 }
  0xe6   : > { %s812_s13 = smov %s567_s14  ;;  %s813_s14 = smov %s633_s21 }
  0xe7   : > { %s814_s15 = smov %s621_s18  ;;  %22 = sbr.rel (!%p20_p12) target bundleno = 7 (0x7), region = 98 }
  0xec   :  { %288 = vsyncpa [#allocation3], 1 }
  0xed   :  { %290 = vsyncpa [#allocation3 + $0x1], 1 }
  0xee   :  { %291 = vsyncpa [#allocation6], 1 }
  0xef   :  { %293 = vsyncpa [#allocation6 + $0x1], 1 }
  0xf0   :  { %294 = vsyncpa [#allocation4], 1 }
  0xf1   :  { %296 = vsyncpa [#allocation4 + $0x1], 1 }

</bundles_post_ra>
